<compile_context>
chip_gen: v7x
topology: tpu7x:2x2x1
jax: 0.10.0
libtpu: 0.0.40
codegen_flags: <defaults>
</compile_context>

<pallas_src>
import jax
import jax.numpy as jnp
from jax.experimental import pallas as pl
from jax.experimental.pallas import tpu as pltpu

LANE = 128
SUBLANE = 8


def _round_up(x, m):
    return ((x + m - 1) // m) * m


# ----------------------------------------------------------------------------
# Pallas kernel: 3 lane-dense GEMMs, weights resident across the N-grid.
# ----------------------------------------------------------------------------
def adpa_kernel(x_ref,              # VMEM (bn, K_pad)   packed per-branch inputs
                w0_ref, b0_ref,     # VMEM (K_pad, H_pad), (1, H_pad)
                w1_ref, b1_ref,     # VMEM (H_pad, H_pad), (1, H_pad)
                wout_ref,           # VMEM (H_pad, O)    scal-folded output proj
                bout_ref,           # VMEM (1, O)
                o_ref):             # VMEM (bn, O)
    # layer 0: block-diagonal Linear over all 7 branches at once + ReLU
    h = jnp.dot(x_ref[...], w0_ref[...],
                preferred_element_type=jnp.float32) + b0_ref[...]
    h = jnp.maximum(h, 0.0)
    # layer 1: block-diagonal Linear + ReLU
    h = jnp.dot(h, w1_ref[...],
                preferred_element_type=jnp.float32) + b1_ref[...]
    h = jnp.maximum(h, 0.0)
    # linear_output (simple_attention scalars already folded into wout rows)
    o_ref[...] = (jnp.dot(h, wout_ref[...],
                          preferred_element_type=jnp.float32)
                  + bout_ref[...]).astype(o_ref.dtype)


# ----------------------------------------------------------------------------
# One-time parameter packing (host/XLA side, done once per weight set).
# ----------------------------------------------------------------------------
def pack_params(scal, W0, B0, W1, B1, Wout, bout):
    """scal (7,), W0 (7,D,H), B0 (7,1,H), W1 (7,H,H), B1 (7,1,H),
       Wout (7,H,O), bout (1,O)  ->  block-diag / padded operands."""
    NB, D, H = W0.shape
    O = Wout.shape[-1]
    K = NB * D                       # 224
    M = NB * H                       # 224
    K_pad = _round_up(K, LANE)       # 256
    H_pad = _round_up(M, LANE)       # 256

    W0_bd = jnp.zeros((K_pad, H_pad), jnp.float32)
    W1_bd = jnp.zeros((H_pad, H_pad), jnp.float32)
    for b in range(NB):              # static 7-iteration pack
        W0_bd = W0_bd.at[b * D:(b + 1) * D, b * H:(b + 1) * H].set(W0[b])
        W1_bd = W1_bd.at[b * H:(b + 1) * H, b * H:(b + 1) * H].set(W1[b])

    b0 = jnp.zeros((1, H_pad), jnp.float32).at[:, :M].set(B0.reshape(1, M))
    b1 = jnp.zeros((1, H_pad), jnp.float32).at[:, :M].set(B1.reshape(1, M))

    # fold per-branch attention scalars into the output-projection rows
    Wout_scaled = Wout.reshape(M, O) * jnp.repeat(scal, H)[:, None]
    Wout_pad = jnp.zeros((H_pad, O), jnp.float32).at[:M, :].set(Wout_scaled)

    return W0_bd, b0, W1_bd, b1, Wout_pad, bout.reshape(1, O).astype(jnp.float32)


# ----------------------------------------------------------------------------
# Forward wrapper: pack feats, grid over N with resident weights.
# ----------------------------------------------------------------------------
def adpa_forward(feats, packed, *, block_n=512):
    """feats: (7, N, D). packed: output of pack_params. Returns (N, O)."""
    W0_bd, b0, W1_bd, b1, Wout_pad, bout = packed
    NB, N, D = feats.shape
    K_pad, H_pad = W0_bd.shape
    O = Wout_pad.shape[-1]

    # pack feats: (7, N, D) -> (N, 7*D) branch-major along lanes (matches
    # W0_bd block placement), then lane-pad to K_pad and row-pad to the block.
    x_wide = feats.transpose(1, 0, 2).reshape(N, NB * D)
    bn = min(block_n, _round_up(N, SUBLANE))
    n_pad = _round_up(N, bn)
    x_wide = jnp.pad(x_wide, ((0, n_pad - N), (0, K_pad - NB * D)))

    grid = (n_pad // bn,)
    out = pl.pallas_call(
        adpa_kernel,
        out_shape=jax.ShapeDtypeStruct((n_pad, O), jnp.float32),
        grid=grid,
        in_specs=[
            pl.BlockSpec((bn, K_pad), lambda i: (i, 0)),      # x rows: pipelined
            pl.BlockSpec((K_pad, H_pad), lambda i: (0, 0)),   # W0_bd: resident
            pl.BlockSpec((1, H_pad), lambda i: (0, 0)),       # b0
            pl.BlockSpec((H_pad, H_pad), lambda i: (0, 0)),   # W1_bd
            pl.BlockSpec((1, H_pad), lambda i: (0, 0)),       # b1
            pl.BlockSpec((H_pad, O), lambda i: (0, 0)),       # Wout (scal folded)
            pl.BlockSpec((1, O), lambda i: (0, 0)),           # bout
        ],
        out_specs=pl.BlockSpec((bn, O), lambda i: (i, 0)),    # full-width in O
        compiler_params=pltpu.CompilerParams(
            dimension_semantics=("parallel",)),
    )(x_wide, W0_bd, b0, W1_bd, b1, Wout_pad, bout)
    return out[:N]


# ----------------------------------------------------------------------------
# Pure-JAX reference (mirrors the PyTorch forward, eval mode).
# ----------------------------------------------------------------------------
def reference(scal, feats, W0, B0, W1, B1, Wout, bout):
    hs = []
    for b in range(feats.shape[0]):
        h = jnp.maximum(feats[b] @ W0[b] + B0[b, 0], 0.0)
        h = jnp.maximum(h @ W1[b] + B1[b, 0], 0.0)
        hs.append(scal[b] * h)
    cat = jnp.concatenate(hs, axis=-1)                 # (N, 7*H)
    Wout_full = Wout.reshape(-1, Wout.shape[-1])       # (7*H, O)
    return cat @ Wout_full + bout[0]


if __name__ == "__main__":
    # Small shapes consistent with the module:
    #   num_nodes N = 16, feat_dim = 32, hidden_dim = 32, output_dim = 16,
    #   num_layers = 2, 7 graph views.
    N, D, H, O, NB = 16, 32, 32, 16, 7
    key = jax.random.PRNGKey(0)
    keys = jax.random.split(key, 8)

    def xavier(k, shape, fan_in, fan_out):
        lim = (6.0 / (fan_in + fan_out)) ** 0.5
        return jax.random.uniform(k, shape, jnp.float32, -lim, lim)

    feats = jax.random.normal(keys[0], (NB, N, D), jnp.float32)   # 7 input feature views
    W0 = xavier(keys[1], (NB, D, H), D, H)
    B0 = 0.01 * jax.random.normal(keys[2], (NB, 1, H), jnp.float32)
    W1 = xavier(keys[3], (NB, H, H), H, H)
    B1 = 0.01 * jax.random.normal(keys[4], (NB, 1, H), jnp.float32)
    scal = jax.random.normal(keys[5], (NB,), jnp.float32)         # 7 learnable scalar weights
    Wout = xavier(keys[6], (NB, H, O), NB * H, O)                 # linear_output weight (split per branch)
    bout = 0.01 * jax.random.normal(keys[7], (1, O), jnp.float32)

    packed = pack_params(scal, W0, B0, W1, B1, Wout, bout)        # one-time weight packing
    out = adpa_forward(feats, packed)
    out = jax.block_until_ready(out)

    ref = reference(scal, feats, W0, B0, W1, B1, Wout, bout)
    assert out.shape == (N, O)
    assert jnp.allclose(out, ref, atol=1e-4, rtol=1e-4), (
        f"max err {jnp.max(jnp.abs(out - ref))}")

    print("KERNEL_OK")
</pallas_src>

<mosaic_0001>
module attributes {stable_mosaic.version = 11 : i64} {
  func.func @adpa_kernel(%arg0: i32, %arg1: memref<16x256xf32, #tpu.memory_space<vmem>>, %arg2: memref<256x256xf32, #tpu.memory_space<vmem>>, %arg3: memref<1x256xf32, #tpu.memory_space<vmem>>, %arg4: memref<256x256xf32, #tpu.memory_space<vmem>>, %arg5: memref<1x256xf32, #tpu.memory_space<vmem>>, %arg6: memref<256x16xf32, #tpu.memory_space<vmem>>, %arg7: memref<1x16xf32, #tpu.memory_space<vmem>>, %arg8: memref<16x16xf32, #tpu.memory_space<vmem>>) attributes {dimension_semantics = [#tpu.dimension_semantics<parallel>], iteration_bounds = array<i64: 1>, scalar_prefetch = 0 : i64, scratch_operands = 0 : i64, tpu.core_type = #tpu.core_type<tc>, window_params = [{transform_indices = @transform_0, window_bounds = array<i64: 16, 256>}, {pipeline_mode = #tpu.pipeline_mode<synchronous>, transform_indices = @transform_1, window_bounds = array<i64: 256, 256>}, {pipeline_mode = #tpu.pipeline_mode<synchronous>, transform_indices = @transform_2, window_bounds = array<i64: 1, 256>}, {pipeline_mode = #tpu.pipeline_mode<synchronous>, transform_indices = @transform_3, window_bounds = array<i64: 256, 256>}, {pipeline_mode = #tpu.pipeline_mode<synchronous>, transform_indices = @transform_4, window_bounds = array<i64: 1, 256>}, {pipeline_mode = #tpu.pipeline_mode<synchronous>, transform_indices = @transform_5, window_bounds = array<i64: 256, 16>}, {pipeline_mode = #tpu.pipeline_mode<synchronous>, transform_indices = @transform_6, window_bounds = array<i64: 1, 16>}, {transform_indices = @transform_7, window_bounds = array<i64: 16, 16>}]} {
    %c0 = arith.constant 0 : index
    %c0_0 = arith.constant 0 : index
    %0 = vector.load %arg1[%c0, %c0_0] : memref<16x256xf32, #tpu.memory_space<vmem>>, vector<16x256xf32>
    %c0_1 = arith.constant 0 : index
    %c0_2 = arith.constant 0 : index
    %1 = vector.load %arg2[%c0_1, %c0_2] : memref<256x256xf32, #tpu.memory_space<vmem>>, vector<256x256xf32>
    %cst = arith.constant dense<0.000000e+00> : vector<16x256xf32>
    %2 = tpu.matmul %0, %1, %cst {dimension_numbers = #tpu.dot_dimension_numbers<[1], [0], [0], [1], [0, 0, 1, 1], [], []>} : vector<16x256xf32>, vector<256x256xf32>, vector<16x256xf32> -> vector<16x256xf32>
    %c0_3 = arith.constant 0 : index
    %c0_4 = arith.constant 0 : index
    %3 = vector.load %arg3[%c0_3, %c0_4] : memref<1x256xf32, #tpu.memory_space<vmem>>, vector<1x256xf32>
    %4 = vector.broadcast %3 : vector<1x256xf32> to vector<16x256xf32>
    %5 = arith.addf %2, %4 : vector<16x256xf32>
    %cst_5 = arith.constant 0.000000e+00 : f32
    %6 = vector.broadcast %cst_5 : f32 to vector<16x256xf32>
    %7 = arith.maximumf %5, %6 : vector<16x256xf32>
    %c0_6 = arith.constant 0 : index
    %c0_7 = arith.constant 0 : index
    %8 = vector.load %arg4[%c0_6, %c0_7] : memref<256x256xf32, #tpu.memory_space<vmem>>, vector<256x256xf32>
    %cst_8 = arith.constant dense<0.000000e+00> : vector<16x256xf32>
    %9 = tpu.matmul %7, %8, %cst_8 {dimension_numbers = #tpu.dot_dimension_numbers<[1], [0], [0], [1], [0, 0, 1, 1], [], []>} : vector<16x256xf32>, vector<256x256xf32>, vector<16x256xf32> -> vector<16x256xf32>
    %c0_9 = arith.constant 0 : index
    %c0_10 = arith.constant 0 : index
    %10 = vector.load %arg5[%c0_9, %c0_10] : memref<1x256xf32, #tpu.memory_space<vmem>>, vector<1x256xf32>
    %11 = vector.broadcast %10 : vector<1x256xf32> to vector<16x256xf32>
    %12 = arith.addf %9, %11 : vector<16x256xf32>
    %cst_11 = arith.constant 0.000000e+00 : f32
    %13 = vector.broadcast %cst_11 : f32 to vector<16x256xf32>
    %14 = arith.maximumf %12, %13 : vector<16x256xf32>
    %c0_12 = arith.constant 0 : index
    %c0_13 = arith.constant 0 : index
    %15 = vector.load %arg6[%c0_12, %c0_13] : memref<256x16xf32, #tpu.memory_space<vmem>>, vector<256x16xf32>
    %cst_14 = arith.constant dense<0.000000e+00> : vector<16x16xf32>
    %16 = tpu.matmul %14, %15, %cst_14 {dimension_numbers = #tpu.dot_dimension_numbers<[1], [0], [0], [1], [0, 0, 1, 1], [], []>} : vector<16x256xf32>, vector<256x16xf32>, vector<16x16xf32> -> vector<16x16xf32>
    %c0_15 = arith.constant 0 : index
    %c0_16 = arith.constant 0 : index
    %17 = vector.load %arg7[%c0_15, %c0_16] : memref<1x16xf32, #tpu.memory_space<vmem>>, vector<1x16xf32>
    %18 = vector.broadcast %17 : vector<1x16xf32> to vector<16x16xf32>
    %19 = arith.addf %16, %18 : vector<16x16xf32>
    %c0_17 = arith.constant 0 : index
    %c0_18 = arith.constant 0 : index
    %20 = vector.load %arg8[%c0_17, %c0_18] : memref<16x16xf32, #tpu.memory_space<vmem>>, vector<16x16xf32>
    tpu.vector_store %arg8[%c0_17, %c0_18], %19 {strides = array<i32>} : memref<16x16xf32, #tpu.memory_space<vmem>>, vector<16x16xf32>,
    return
  }
  func.func @transform_0(%arg0: i32) -> (i32, i32) {
    %c0_i32 = arith.constant 0 : i32
    %c0_i32_0 = arith.constant 0 : i32
    return %arg0, %c0_i32 : i32, i32
  }
  func.func @transform_1(%arg0: i32) -> (i32, i32) {
    %c0_i32 = arith.constant 0 : i32
    %c0_i32_0 = arith.constant 0 : i32
    %c0_i32_1 = arith.constant 0 : i32
    return %c0_i32, %c0_i32_0 : i32, i32
  }
  func.func @transform_2(%arg0: i32) -> (i32, i32) {
    %c0_i32 = arith.constant 0 : i32
    %c0_i32_0 = arith.constant 0 : i32
    %c0_i32_1 = arith.constant 0 : i32
    return %c0_i32, %c0_i32_0 : i32, i32
  }
  func.func @transform_3(%arg0: i32) -> (i32, i32) {
    %c0_i32 = arith.constant 0 : i32
    %c0_i32_0 = arith.constant 0 : i32
    %c0_i32_1 = arith.constant 0 : i32
    return %c0_i32, %c0_i32_0 : i32, i32
  }
  func.func @transform_4(%arg0: i32) -> (i32, i32) {
    %c0_i32 = arith.constant 0 : i32
    %c0_i32_0 = arith.constant 0 : i32
    %c0_i32_1 = arith.constant 0 : i32
    return %c0_i32, %c0_i32_0 : i32, i32
  }
  func.func @transform_5(%arg0: i32) -> (i32, i32) {
    %c0_i32 = arith.constant 0 : i32
    %c0_i32_0 = arith.constant 0 : i32
    %c0_i32_1 = arith.constant 0 : i32
    return %c0_i32, %c0_i32_0 : i32, i32
  }
  func.func @transform_6(%arg0: i32) -> (i32, i32) {
    %c0_i32 = arith.constant 0 : i32
    %c0_i32_0 = arith.constant 0 : i32
    %c0_i32_1 = arith.constant 0 : i32
    return %c0_i32, %c0_i32_0 : i32, i32
  }
  func.func @transform_7(%arg0: i32) -> (i32, i32) {
    %c0_i32 = arith.constant 0 : i32
    %c0_i32_0 = arith.constant 0 : i32
    return %arg0, %c0_i32 : i32, i32
  }
}

</mosaic_0001>

<bundles_post_ra>
// kernel: tpu_custom_call.1
= control target key start
LH: loop header
LB: loop body
LE: loop exit
PB: predicated region body
PF: predicated region fallthrough
CT: control target
= control target key end

     0   :  { %12 = vsyncpa [#allocation3], 0  ;;  %s1010_s0 = inlined_call_operand.vmem [shape: f32[16,256], index: 0, kind: input, shape index: {}]   ;;  %s1011_s1 = inlined_call_operand.hbm [shape: f32[256,256], index: 1, kind: input, shape index: {}]   ;;  %s1012_s2 = inlined_call_operand.vmem [shape: f32[1,256], index: 2, kind: input, shape index: {}]   ;;  %s1013_s3 = inlined_call_operand.hbm [shape: f32[256,256], index: 3, kind: input, shape index: {}]   ;;  %s1014_s4 = inlined_call_operand.vmem [shape: f32[1,256], index: 4, kind: input, shape index: {}]   ;;  %s1015_s5 = inlined_call_operand.vmem [shape: f32[256,16], index: 5, kind: input, shape index: {}]   ;;  %s1016_s6 = inlined_call_operand.vmem [shape: f32[1,16], index: 6, kind: input, shape index: {}]   ;;  %s1017_s7 = inlined_call_operand.hbm [shape: f32[16,16], index: 7, kind: output, shape index: {}]  }
   0x1   :  { %13 = vsyncpa [#allocation6], 0 }
   0x2   :  { %14 = vsyncpa [#allocation4], 0  ;;  %s802_s24 = smov [#allocation2]   ;;  %s730_s28 = scalar_lea.hbm %s1011_s1, 8192 }
   0x3   :  { %s22_s25 = sshll.u32 %s802_s24, 4  ;;  %p731_p0 = scmp.ne.s32.totalorder %s1011_s1, %s730_s28  ;;  %s23_s25 = int_to_ptr.vmem [resolvable:$true] %s22_s25 }
   0x4   :  { %p734_p1 = scmp.lt.u32.totalorder %s730_s28, %s1011_s1 }
   0x6   :  { %p736_p2 = pnand %p734_p1, %p731_p0 }
   0x8   :  { %739 = shalt.err (!%p736_p2)
}
   0x9   :  { %s740_s10 = scalar_lea.vmem %s23_s25, 8192  ;;  %p745_p4 = scmp.lt.s32.totalorder %s23_s25, %s23_s25 }
   0xa   :  { %p741_p3 = scmp.ne.s32.totalorder %s23_s25, %s740_s10  ;;  %p746_p5 = scmp.lt.s32.totalorder %s740_s10, %s740_s10 }
   0xc   :  { %p747_p6 = por %p746_p5, %p745_p4 }
   0xe   :  { %p748_p7 = pnand %p747_p6, %p741_p3 }
  0x10   :  { %751 = shalt.err (!%p748_p7)
}
  0x11   :  { %s803_s11 = smov 256   ;;  %s804_s12 = smov 16  }
  0x12   :  { %28 = dma.hbm_to_vmem [thread:$0]  %s1011_s1, 8192, %s23_s25, [#allocation3], %s803_s11, %s803_s11, %s804_s12  }
  0x13   :  { %s805_s15 = smov [#allocation5]   ;;  %s752_s19 = scalar_lea.hbm %s1013_s3, 8192 }
  0x14   :  { %s36_s16 = sshll.u32 %s805_s15, 4  ;;  %p753_p8 = scmp.ne.s32.totalorder %s1013_s3, %s752_s19  ;;  %s37_s16 = int_to_ptr.vmem [resolvable:$true] %s36_s16 }
  0x15   :  { %p756_p9 = scmp.lt.u32.totalorder %s752_s19, %s1013_s3 }
  0x17   :  { %p758_p10 = pnand %p756_p9, %p753_p8 }
  0x19   :  { %761 = shalt.err (!%p758_p10)
}
  0x1a   :  { %s762_s24 = scalar_lea.vmem %s37_s16, 8192  ;;  %p767_p12 = scmp.lt.s32.totalorder %s37_s16, %s37_s16 }
  0x1b   :  { %p763_p11 = scmp.ne.s32.totalorder %s37_s16, %s762_s24  ;;  %p768_p13 = scmp.lt.s32.totalorder %s762_s24, %s762_s24 }
  0x1d   :  { %p769_p0 = por %p768_p13, %p767_p12 }
  0x1f   :  { %p770_p1 = pnand %p769_p0, %p763_p11 }
  0x21   :  { %773 = shalt.err (!%p770_p1)
}
  0x22   :  { %42 = dma.hbm_to_vmem [thread:$0]  %s1013_s3, 8192, %s37_s16, [#allocation6], %s803_s11, %s803_s11, %s804_s12  }
  0x23   :  { %796 = dma.done.wait [#allocation3], 8192  }
  0x24   :  { %797 = vsyncadd [#allocation3], 4294959104 }
  0x25   :  { %798 = dma.done.wait [#allocation6], 8192  }
  0x26   :  { %799 = vsyncadd [#allocation6], 4294959104  ;;  %v60_v0 = vld [vmem:[#allocation2 + $0x8] sm:$0xff]  ;;  %v62_v1 = vld [vmem:[#allocation2 + $0x18] sm:$0xff]  ;;  %vm487_vm0 = vcmask 130048   ;;  %s806_s24 = smov [#allocation7]  }
  0x27   :  { %v59_v2 = vld [vmem:[#allocation2] sm:$0xff]  ;;  %v547_v3 = vpack.c.bf16 %v62_v1, %v60_v0  ;;  %v61_v4 = vld [vmem:[#allocation2 + $0x10] sm:$0xff]  ;;  %v64_v5 = vld [vmem:[#allocation2 + $0x28] sm:$0xff]  ;;  %s495_s1 = sshll.u32 %s806_s24, 4  ;;  %s496_s1 = int_to_ptr.vmem [resolvable:$true] %s495_s1 }
  0x28   :  { %v66_v6 = vld [vmem:[#allocation2 + $0x38] sm:$0xff]  ;;  %v549_v7 = vpack.c.bf16 %v61_v4, %v59_v2  ;;  %v63_v9 = vld [vmem:[#allocation2 + $0x20] sm:$0xff]  ;;  %v65_v10 = vld [vmem:[#allocation2 + $0x30] sm:$0xff]  ;;  %s774_s25 = scalar_lea.vmem %s496_s1, 256  ;;  %p779_p3 = scmp.lt.s32.totalorder %s496_s1, %s496_s1 }
  0x29   :  { %v551_v8 = vpack.c.bf16 %v66_v6, %v64_v5  ;;  %v68_v11 = vld [vmem:[#allocation2 + $0x48] sm:$0xff]  ;;  %548 = vmatprep.subr.bf16.mxu0 %v547_v3  ;;  %v70_v12 = vld [vmem:[#allocation2 + $0x58] sm:$0xff]  ;;  %v553_v13 = vpack.c.bf16 %v65_v10, %v63_v9  ;;  %v67_v15 = vld [vmem:[#allocation2 + $0x40] sm:$0xff]  ;;  %p775_p2 = scmp.ne.s32.totalorder %s496_s1, %s774_s25  ;;  %p780_p4 = scmp.lt.s32.totalorder %s774_s25, %s774_s25 }
  0x2a   :  { %550 = vmatpush1.bf16.msra.mxu0 %v549_v7  ;;  %v555_v14 = vpack.c.bf16 %v70_v12, %v68_v11  ;;  %v69_v16 = vld [vmem:[#allocation2 + $0x50] sm:$0xff]  ;;  %v72_v17 = vld [vmem:[#allocation2 + $0x68] sm:$0xff]  ;;  %v74_v18 = vld [vmem:[#allocation2 + $0x78] sm:$0xff] }
  0x2b   :  { %552 = vmatprep.subr.bf16.mxu0 %v551_v8  ;;  %v557_v19 = vpack.c.bf16 %v69_v16, %v67_v15  ;;  %v559_v20 = vpack.c.bf16 %v74_v18, %v72_v17  ;;  %v71_v21 = vld [vmem:[#allocation2 + $0x60] sm:$0xff]  ;;  %v73_v22 = vld [vmem:[#allocation2 + $0x70] sm:$0xff]  ;;  %v76_v23 = vld [vmem:[#allocation2 + $0x88] sm:$0xff]  ;;  %p781_p5 = por %p780_p4, %p779_p3 }
  0x2c   :  { %v78_v24 = vld [vmem:[#allocation2 + $0x98] sm:$0xff]  ;;  %v561_v25 = vpack.c.bf16 %v73_v22, %v71_v21  ;;  %v75_v27 = vld [vmem:[#allocation2 + $0x80] sm:$0xff]  ;;  %v77_v28 = vld [vmem:[#allocation2 + $0x90] sm:$0xff] }
  0x2d   :  { %v563_v26 = vpack.c.bf16 %v78_v24, %v76_v23  ;;  %v80_v29 = vld [vmem:[#allocation2 + $0xa8] sm:$0xff]  ;;  %v82_v30 = vld [vmem:[#allocation2 + $0xb8] sm:$0xff]  ;;  %v565_v31 = vpack.c.bf16 %v77_v28, %v75_v27  ;;  %v79_v33 = vld [vmem:[#allocation2 + $0xa0] sm:$0xff]  ;;  %p782_p6 = pnand %p781_p5, %p775_p2 }
  0x2e   :  { %554 = vmatpush1.bf16.msra.mxu0 %v553_v13  ;;  %v567_v32 = vpack.c.bf16 %v82_v30, %v80_v29  ;;  %v81_v34 = vld [vmem:[#allocation2 + $0xb0] sm:$0xff]  ;;  %v84_v35 = vld [vmem:[#allocation2 + $0xc8] sm:$0xff]  ;;  %v86_v36 = vld [vmem:[#allocation2 + $0xd8] sm:$0xff] }
  0x2f   :  { %556 = vmatprep.subr.bf16.mxu0 %v555_v14  ;;  %v569_v37 = vpack.c.bf16 %v81_v34, %v79_v33  ;;  %v571_v38 = vpack.c.bf16 %v86_v36, %v84_v35  ;;  %v83_v39 = vld [vmem:[#allocation2 + $0xc0] sm:$0xff]  ;;  %v85_v40 = vld [vmem:[#allocation2 + $0xd0] sm:$0xff]  ;;  %v56_v41 = vld [vmem:[%s1010_s0 + $0x8] sm:$0xff] }
  0x30   :  { %v88_v42 = vld [vmem:[#allocation2 + $0xe8] sm:$0xff]  ;;  %v90_v43 = vld [vmem:[#allocation2 + $0xf8] sm:$0xff]  ;;  %199 = vmatprep.mubr.f32.mxu0 %v56_v41  ;;  %v87_v45 = vld [vmem:[#allocation2 + $0xe0] sm:$0xff]  ;;  %v573_v50 = vpack.c.bf16 %v85_v40, %v83_v39 }
  0x31   :  { %v217_v44 = vld [vmem:[#allocation5 + $0x8] sm:$0xff]  ;;  %v89_v46 = vld [vmem:[#allocation2 + $0xf0] sm:$0xff]  ;;  %v219_v47 = vld [vmem:[#allocation5 + $0x18] sm:$0xff]  ;;  %v575_v56 = vpack.c.bf16 %v90_v43, %v88_v42 }
  0x32   :  { %558 = vmatpush1.bf16.msra.mxu0 %v557_v19  ;;  %v216_v48 = vld [vmem:[#allocation5] sm:$0xff]  ;;  %v218_v49 = vld [vmem:[#allocation5 + $0x10] sm:$0xff]  ;;  %v611_v51 = vpack.c.bf16 %v219_v47, %v217_v44  ;;  %v221_v53 = vld [vmem:[#allocation5 + $0x28] sm:$0xff]  ;;  %v577_v0 = vpack.c.bf16 %v89_v46, %v87_v45 }
  0x33   :  { %560 = vmatprep.subr.bf16.mxu0 %v559_v20  ;;  %v613_v52 = vpack.c.bf16 %v218_v49, %v216_v48  ;;  %v223_v54 = vld [vmem:[#allocation5 + $0x38] sm:$0xff]  ;;  %v220_v55 = vld [vmem:[#allocation5 + $0x20] sm:$0xff]  ;;  %v222_v58 = vld [vmem:[#allocation5 + $0x30] sm:$0xff] }
  0x34   :  { %v615_v57 = vpack.c.bf16 %v223_v54, %v221_v53  ;;  %v225_v59 = vld [vmem:[#allocation5 + $0x48] sm:$0xff]  ;;  %v227_v60 = vld [vmem:[#allocation5 + $0x58] sm:$0xff]  ;;  %612 = vmatprep.subr.bf16.mxu1 %v611_v51  ;;  %v617_v63 = vpack.c.bf16 %v222_v58, %v220_v55  ;;  %v91_v1 = vld [vmem:[#allocation2 + $0x100] sm:$0xff] }
  0x35   :  { %v92_v61 = vld [vmem:[#allocation2 + $0x108] sm:$0xff]  ;;  %v94_v62 = vld [vmem:[#allocation2 + $0x118] sm:$0xff]  ;;  %614 = vmatpush1.bf16.msra.mxu1 %v613_v52  ;;  %v619_v2 = vpack.c.bf16 %v227_v60, %v225_v59  ;;  %v224_v3 = vld [vmem:[#allocation5 + $0x40] sm:$0xff] }
  0x36   :  { %562 = vmatpush1.bf16.msra.mxu0 %v561_v25  ;;  %616 = vmatprep.subr.bf16.mxu1 %v615_v57  ;;  %v226_v4 = vld [vmem:[#allocation5 + $0x50] sm:$0xff]  ;;  %v579_v5 = vpack.c.bf16 %v94_v62, %v92_v61  ;;  %v229_v7 = vld [vmem:[#allocation5 + $0x68] sm:$0xff]  ;;  %v231_v8 = vld [vmem:[#allocation5 + $0x78] sm:$0xff] }
  0x37   :  { %564 = vmatprep.subr.bf16.mxu0 %v563_v26  ;;  %v93_v6 = vld [vmem:[#allocation2 + $0x110] sm:$0xff]  ;;  %v96_v9 = vld [vmem:[#allocation2 + $0x128] sm:$0xff]  ;;  %v98_v10 = vld [vmem:[#allocation2 + $0x138] sm:$0xff]  ;;  %v621_v11 = vpack.c.bf16 %v226_v4, %v224_v3  ;;  %v623_v14 = vpack.c.bf16 %v231_v8, %v229_v7 }
  0x38   :  { %v581_v12 = vpack.c.bf16 %v93_v6, %v91_v1  ;;  %v95_v13 = vld [vmem:[#allocation2 + $0x120] sm:$0xff]  ;;  %v230_v16 = vld [vmem:[#allocation5 + $0x70] sm:$0xff]  ;;  %v583_v17 = vpack.c.bf16 %v98_v10, %v96_v9  ;;  %v233_v19 = vld [vmem:[#allocation5 + $0x88] sm:$0xff] }
  0x39   :  { %618 = vmatpush1.bf16.msra.mxu1 %v617_v63  ;;  %v228_v15 = vld [vmem:[#allocation5 + $0x60] sm:$0xff]  ;;  %v97_v18 = vld [vmem:[#allocation2 + $0x130] sm:$0xff]  ;;  %v235_v20 = vld [vmem:[#allocation5 + $0x98] sm:$0xff] }
  0x3a   :  { %566 = vmatpush1.bf16.msra.mxu0 %v565_v31  ;;  %620 = vmatprep.subr.bf16.mxu1 %v619_v2  ;;  %v100_v21 = vld [vmem:[#allocation2 + $0x148] sm:$0xff]  ;;  %v102_v22 = vld [vmem:[#allocation2 + $0x158] sm:$0xff]  ;;  %v625_v23 = vpack.c.bf16 %v230_v16, %v228_v15  ;;  %v585_v24 = vpack.c.bf16 %v97_v18, %v95_v13  ;;  %v99_v25 = vld [vmem:[#allocation2 + $0x140] sm:$0xff]  ;;  %v627_v26 = vpack.c.bf16 %v235_v20, %v233_v19 }
  0x3b   :  { %568 = vmatprep.subr.bf16.mxu0 %v567_v32  ;;  %v232_v27 = vld [vmem:[#allocation5 + $0x80] sm:$0xff]  ;;  %v234_v28 = vld [vmem:[#allocation5 + $0x90] sm:$0xff]  ;;  %v587_v29 = vpack.c.bf16 %v102_v22, %v100_v21  ;;  %v237_v31 = vld [vmem:[#allocation5 + $0xa8] sm:$0xff] }
  0x3c   :  { %v101_v30 = vld [vmem:[#allocation2 + $0x150] sm:$0xff]  ;;  %v239_v32 = vld [vmem:[#allocation5 + $0xb8] sm:$0xff]  ;;  %v104_v33 = vld [vmem:[#allocation2 + $0x168] sm:$0xff]  ;;  %v629_v35 = vpack.c.bf16 %v234_v28, %v232_v27 }
  0x3d   :  { %622 = vmatpush1.bf16.msra.mxu1 %v621_v11  ;;  %v106_v34 = vld [vmem:[#allocation2 + $0x178] sm:$0xff]  ;;  %v589_v36 = vpack.c.bf16 %v101_v30, %v99_v25  ;;  %v236_v39 = vld [vmem:[#allocation5 + $0xa0] sm:$0xff]  ;;  %v238_v40 = vld [vmem:[#allocation5 + $0xb0] sm:$0xff] }
  0x3e   :  { %570 = vmatpush1.bf16.msra.mxu0 %v569_v37  ;;  %624 = vmatprep.subr.bf16.mxu1 %v623_v14  ;;  %v103_v37 = vld [vmem:[#allocation2 + $0x160] sm:$0xff]  ;;  %v591_v41 = vpack.c.bf16 %v106_v34, %v104_v33  ;;  %v105_v42 = vld [vmem:[#allocation2 + $0x170] sm:$0xff]  ;;  %v241_v43 = vld [vmem:[#allocation5 + $0xc8] sm:$0xff]  ;;  %v633_v47 = vpack.c.bf16 %v238_v40, %v236_v39 }
  0x3f   :  { %572 = vmatprep.subr.bf16.mxu0 %v571_v38  ;;  %v631_v38 = vpack.c.bf16 %v239_v32, %v237_v31  ;;  %v243_v44 = vld [vmem:[#allocation5 + $0xd8] sm:$0xff]  ;;  %v108_v45 = vld [vmem:[#allocation2 + $0x188] sm:$0xff]  ;;  %v593_v48 = vpack.c.bf16 %v105_v42, %v103_v37  ;;  %v107_v49 = vld [vmem:[#allocation2 + $0x180] sm:$0xff] }
  0x40   :  { %v110_v46 = vld [vmem:[#allocation2 + $0x198] sm:$0xff]  ;;  %v240_v51 = vld [vmem:[#allocation5 + $0xc0] sm:$0xff]  ;;  %v242_v52 = vld [vmem:[#allocation5 + $0xd0] sm:$0xff] }
  0x41   :  { %626 = vmatpush1.bf16.msra.mxu1 %v625_v23  ;;  %v595_v53 = vpack.c.bf16 %v110_v46, %v108_v45  ;;  %v109_v54 = vld [vmem:[#allocation2 + $0x190] sm:$0xff]  ;;  %v245_v55 = vld [vmem:[#allocation5 + $0xe8] sm:$0xff]  ;;  %v114_v58 = vld [vmem:[#allocation2 + $0x1b8] sm:$0xff]  ;;  %v637_v59 = vpack.c.bf16 %v242_v52, %v240_v51 }
  0x42   :  { %574 = vmatpush1.bf16.msra.mxu0 %v573_v50  ;;  %628 = vmatprep.subr.bf16.mxu1 %v627_v26  ;;  %v635_v50 = vpack.c.bf16 %v243_v44, %v241_v43  ;;  %v112_v57 = vld [vmem:[#allocation2 + $0x1a8] sm:$0xff]  ;;  %v597_v60 = vpack.c.bf16 %v109_v54, %v107_v49  ;;  %v111_v61 = vld [vmem:[#allocation2 + $0x1a0] sm:$0xff]  ;;  %v113_v2 = vld [vmem:[#allocation2 + $0x1b0] sm:$0xff] }
  0x43   :  { %576 = vmatprep.subr.bf16.mxu0 %v575_v56  ;;  %v247_v56 = vld [vmem:[#allocation5 + $0xf8] sm:$0xff]  ;;  %v244_v63 = vld [vmem:[#allocation5 + $0xe0] sm:$0xff]  ;;  %v599_v1 = vpack.c.bf16 %v114_v58, %v112_v57  ;;  %v249_v3 = vld [vmem:[#allocation5 + $0x108] sm:$0xff]  ;;  %v601_v8 = vpack.c.bf16 %v113_v2, %v111_v61 }
  0x44   :  { %v639_v62 = vpack.c.bf16 %v247_v56, %v245_v55  ;;  %v251_v4 = vld [vmem:[#allocation5 + $0x118] sm:$0xff]  ;;  %v115_v9 = vld [vmem:[#allocation2 + $0x1c0] sm:$0xff]  ;;  %v117_v14 = vld [vmem:[#allocation2 + $0x1d0] sm:$0xff] }
  0x45   :  { %630 = vmatpush1.bf16.msra.mxu1 %v629_v35  ;;  %v118_v6 = vld [vmem:[#allocation2 + $0x1d8] sm:$0xff]  ;;  %v643_v10 = vpack.c.bf16 %v251_v4, %v249_v3  ;;  %v248_v11 = vld [vmem:[#allocation5 + $0x100] sm:$0xff]  ;;  %v253_v15 = vld [vmem:[#allocation5 + $0x128] sm:$0xff]  ;;  %v605_v20 = vpack.c.bf16 %v117_v14, %v115_v9 }
  0x46   :  { %578 = vmatpush1.bf16.msra.mxu0 %v577_v0  ;;  %632 = vmatprep.subr.bf16.mxu1 %v631_v38  ;;  %v246_v0 = vld [vmem:[#allocation5 + $0xf0] sm:$0xff]  ;;  %v255_v16 = vld [vmem:[#allocation5 + $0x138] sm:$0xff]  ;;  %v119_v21 = vld [vmem:[#allocation2 + $0x1e0] sm:$0xff] }
  0x47   :  { %580 = vmatprep.subr.bf16.mxu0 %v579_v5  ;;  %v116_v5 = vld [vmem:[#allocation2 + $0x1c8] sm:$0xff]  ;;  %v641_v7 = vpack.c.bf16 %v246_v0, %v244_v63  ;;  %v122_v18 = vld [vmem:[#allocation2 + $0x1f8] sm:$0xff]  ;;  %v647_v22 = vpack.c.bf16 %v255_v16, %v253_v15  ;;  %v252_v23 = vld [vmem:[#allocation5 + $0x120] sm:$0xff] }
  0x48   :  { %v603_v13 = vpack.c.bf16 %v118_v6, %v116_v5  ;;  %v121_v26 = vld [vmem:[#allocation2 + $0x1f0] sm:$0xff]  ;;  %v257_v27 = vld [vmem:[#allocation5 + $0x148] sm:$0xff]  ;;  %v259_v28 = vld [vmem:[#allocation5 + $0x158] sm:$0xff] }
  0x49   :  { %634 = vmatpush1.bf16.msra.mxu1 %v633_v47  ;;  %v609_v30 = vpack.c.bf16 %v121_v26, %v119_v21  ;;  %v651_v31 = vpack.c.bf16 %v259_v28, %v257_v27  ;;  %v256_v32 = vld [vmem:[#allocation5 + $0x140] sm:$0xff]  ;;  %v258_v33 = vld [vmem:[#allocation5 + $0x150] sm:$0xff]  ;;  %v261_v34 = vld [vmem:[#allocation5 + $0x168] sm:$0xff] }
  0x4a   :  { %582 = vmatpush1.bf16.msra.mxu0 %v581_v12  ;;  %636 = vmatprep.subr.bf16.mxu1 %v635_v50  ;;  %v250_v12 = vld [vmem:[#allocation5 + $0x110] sm:$0xff]  ;;  %v263_v35 = vld [vmem:[#allocation5 + $0x178] sm:$0xff]  ;;  %v55_v37 = vld [vmem:[%s1010_s0] sm:$0xff] }
  0x4b   :  { %584 = vmatprep.subr.bf16.mxu0 %v583_v17  ;;  %v120_v17 = vld [vmem:[#allocation2 + $0x1e8] sm:$0xff]  ;;  %v645_v19 = vpack.c.bf16 %v250_v12, %v248_v11  ;;  %v655_v38 = vpack.c.bf16 %v263_v35, %v261_v34  ;;  %v260_v39 = vld [vmem:[#allocation5 + $0x160] sm:$0xff]  ;;  %v262_v40 = vld [vmem:[#allocation5 + $0x170] sm:$0xff] }
  0x4c   :  { %v607_v25 = vpack.c.bf16 %v122_v18, %v120_v17  ;;  %v265_v42 = vld [vmem:[#allocation5 + $0x188] sm:$0xff]  ;;  %v267_v43 = vld [vmem:[#allocation5 + $0x198] sm:$0xff]  ;;  %v657_v44 = vpack.c.bf16 %v262_v40, %v260_v39  ;;  %v57_v45 = vld [vmem:[%s1010_s0 + $0x10] sm:$0xff] }
  0x4d   :  { %638 = vmatpush1.bf16.msra.mxu1 %v637_v59  ;;  %v659_v46 = vpack.c.bf16 %v267_v43, %v265_v42  ;;  %v264_v47 = vld [vmem:[#allocation5 + $0x180] sm:$0xff]  ;;  %v269_v49 = vld [vmem:[#allocation5 + $0x1a8] sm:$0xff]  ;;  %v271_v50 = vld [vmem:[#allocation5 + $0x1b8] sm:$0xff]  ;;  %v125_v43 = vlaneseq }
  0x4e   :  { %586 = vmatpush1.bf16.msra.mxu0 %v585_v24  ;;  %640 = vmatprep.subr.bf16.mxu1 %v639_v62  ;;  %v254_v24 = vld [vmem:[#allocation5 + $0x130] sm:$0xff]  ;;  %v663_v52 = vpack.c.bf16 %v271_v50, %v269_v49  ;;  %v273_v55 = vld [vmem:[#allocation5 + $0x1c8] sm:$0xff]  ;;  %v275_v56 = vld [vmem:[#allocation5 + $0x1d8] sm:$0xff] }
  0x4f   :  { %588 = vmatprep.subr.bf16.mxu0 %v587_v29  ;;  %v649_v29 = vpack.c.bf16 %v254_v24, %v252_v23  ;;  %v270_v54 = vld [vmem:[#allocation5 + $0x1b0] sm:$0xff]  ;;  %v667_v58 = vpack.c.bf16 %v275_v56, %v273_v55  ;;  %v272_v59 = vld [vmem:[#allocation5 + $0x1c0] sm:$0xff]  ;;  %v277_v62 = vld [vmem:[#allocation5 + $0x1e8] sm:$0xff] }
  0x50   :  { %v279_v63 = vld [vmem:[#allocation5 + $0x1f8] sm:$0xff]  ;;  %v278_v2 = vld [vmem:[#allocation5 + $0x1f0] sm:$0xff]  ;;  %v389_v4 = vld [vmem:[%s1015_s5 + $0x80] sm:$0xff] }
  0x51   :  { %642 = vmatpush1.bf16.msra.mxu1 %v641_v7  ;;  %v671_v0 = vpack.c.bf16 %v279_v63, %v277_v62  ;;  %v390_v5 = vld [vmem:[%s1015_s5 + $0x88] sm:$0xff]  ;;  %v373_v6 = vld [vmem:[%s1015_s5] sm:$0xff]  ;;  %v391_v9 = vld [vmem:[%s1015_s5 + $0x90] sm:$0xff] }
  0x52   :  { %590 = vmatpush1.bf16.msra.mxu0 %v589_v36  ;;  %644 = vmatprep.subr.bf16.mxu1 %v643_v10  ;;  %v653_v36 = vpack.c.bf16 %v258_v33, %v256_v32  ;;  %v675_v7 = vpack.c.bf16 %v390_v5, %v389_v4  ;;  %v392_v10 = vld [vmem:[%s1015_s5 + $0x98] sm:$0xff]  ;;  %v393_v15 = vld [vmem:[%s1015_s5 + $0xa0] sm:$0xff]  ;;  %v394_v16 = vld [vmem:[%s1015_s5 + $0xa8] sm:$0xff] }
  0x53   :  { %592 = vmatprep.subr.bf16.mxu0 %v591_v41  ;;  %v58_v41 = vld [vmem:[%s1010_s0 + $0x18] sm:$0xff]  ;;  %v905_v12 = vpack.c.bf16 %v392_v10, %v391_v9  ;;  %v683_v18 = vpack.c.bf16 %v394_v16, %v393_v15  ;;  %v395_v21 = vld [vmem:[%s1015_s5 + $0xb0] sm:$0xff]  ;;  %v397_v27 = vld [vmem:[%s1015_s5 + $0xc0] sm:$0xff] }
  0x54   :  { %v376_v14 = vld [vmem:[%s1015_s5 + $0x18] sm:$0xff]  ;;  %v398_v28 = vld [vmem:[%s1015_s5 + $0xc8] sm:$0xff]  ;;  %v399_v33 = vld [vmem:[%s1015_s5 + $0xd0] sm:$0xff] }
  0x55   :  { %646 = vmatpush1.bf16.msra.mxu1 %v645_v19  ;;  %v377_v19 = vld [vmem:[%s1015_s5 + $0x20] sm:$0xff]  ;;  %v380_v26 = vld [vmem:[%s1015_s5 + $0x38] sm:$0xff]  ;;  %v382_v32 = vld [vmem:[%s1015_s5 + $0x48] sm:$0xff] }
  0x56   :  { %594 = vmatpush1.bf16.msra.mxu0 %v593_v48  ;;  %648 = vmatprep.subr.bf16.mxu1 %v647_v22  ;;  %v266_v48 = vld [vmem:[#allocation5 + $0x190] sm:$0xff]  ;;  %v396_v22 = vld [vmem:[%s1015_s5 + $0xb8] sm:$0xff]  ;;  %v401_v39 = vld [vmem:[%s1015_s5 + $0xe0] sm:$0xff] }
  0x57   :  { %596 = vmatprep.subr.bf16.mxu0 %v595_v53  ;;  %v661_v51 = vpack.c.bf16 %v266_v48, %v264_v47  ;;  %v268_v53 = vld [vmem:[#allocation5 + $0x1a0] sm:$0xff]  ;;  %v687_v24 = vpack.c.bf16 %v396_v22, %v395_v21  ;;  %v400_v34 = vld [vmem:[%s1015_s5 + $0xd8] sm:$0xff]  ;;  %v402_v40 = vld [vmem:[%s1015_s5 + $0xe8] sm:$0xff] }
  0x58   :  { %v665_v57 = vpack.c.bf16 %v270_v54, %v268_v53  ;;  %v699_v42 = vpack.c.bf16 %v402_v40, %v401_v39  ;;  %v385_v62 = vld [vmem:[%s1015_s5 + $0x60] sm:$0xff]  ;;  %v386_v63 = vld [vmem:[%s1015_s5 + $0x68] sm:$0xff]  ;;  %v387_v4 = vld [vmem:[%s1015_s5 + $0x70] sm:$0xff] }
  0x59   :  { %650 = vmatpush1.bf16.msra.mxu1 %v649_v29  ;;  %v388_v5 = vld [vmem:[%s1015_s5 + $0x78] sm:$0xff] }
  0x5a   :  { %598 = vmatpush1.bf16.msra.mxu0 %v597_v60  ;;  %652 = vmatprep.subr.bf16.mxu1 %v651_v31  ;;  %v274_v60 = vld [vmem:[#allocation5 + $0x1d0] sm:$0xff]  ;;  %v381_v31 = vld [vmem:[%s1015_s5 + $0x40] sm:$0xff] }
  0x5b   :  { %600 = vmatprep.subr.bf16.mxu0 %v599_v1  ;;  %v669_v61 = vpack.c.bf16 %v274_v60, %v272_v59  ;;  %v276_v1 = vld [vmem:[#allocation5 + $0x1e0] sm:$0xff]  ;;  %v693_v35 = vpack.c.bf16 %v382_v32, %v381_v31 }
  0x5c   :  { %v673_v3 = vpack.c.bf16 %v278_v2, %v276_v1  ;;  %v403_v1 = vld [vmem:[%s1015_s5 + $0xf0] sm:$0xff]  ;;  %v404_v2 = vld [vmem:[%s1015_s5 + $0xf8] sm:$0xff] }
  0x5d   :  { %654 = vmatpush1.bf16.msra.mxu1 %v653_v36  ;;  %v695_v36 = vpack.c.bf16 %v400_v34, %v399_v33 }
  0x5e   :  { %602 = vmatpush1.bf16.msra.mxu0 %v601_v8  ;;  %656 = vmatprep.subr.bf16.mxu1 %v655_v38  ;;  %v374_v8 = vld [vmem:[%s1015_s5 + $0x8] sm:$0xff]  ;;  %v384_v38 = vld [vmem:[%s1015_s5 + $0x58] sm:$0xff] }
  0x5f   :  { %604 = vmatprep.subr.bf16.mxu0 %v603_v13  ;;  %v903_v11 = vpack.c.bf16 %v374_v8, %v373_v6  ;;  %v375_v13 = vld [vmem:[%s1015_s5 + $0x10] sm:$0xff]  ;;  %v705_v6 = vpack.c.bf16 %v388_v5, %v387_v4 }
  0x60   :  { %v681_v17 = vpack.c.bf16 %v376_v14, %v375_v13 }
  0x61   :  { %658 = vmatpush1.bf16.msra.mxu1 %v657_v44  ;;  %v126_v44 = vshrl.u32 %v125_v43, 7 }
  0x62   :  { %606 = vmatpush1.bf16.msra.mxu0 %v605_v20  ;;  %660 = vmatprep.subr.bf16.mxu1 %v659_v46  ;;  %v378_v20 = vld [vmem:[%s1015_s5 + $0x28] sm:$0xff]  ;;  %v123_v46 = vld [vmem:[%s1012_s2] sm:$0x3] }
  0x63   :  { %608 = vmatprep.subr.bf16.mxu0 %v607_v25  ;;  %v685_v23 = vpack.c.bf16 %v378_v20, %v377_v19  ;;  %v379_v25 = vld [vmem:[%s1015_s5 + $0x30] sm:$0xff]  ;;  %v131_v47 = vsub.s32 1, %v126_v44 }
  0x64   :  { %v689_v29 = vpack.c.bf16 %v380_v26, %v379_v25 }
  0x65   :  { %662 = vmatpush1.bf16.msra.mxu1 %v661_v51  ;;  %v132_v49 = vrot.slane %v123_v46, %v131_v47 }
  0x66   :  { %610 = vmatpush1.bf16.msra.mxu0 %v609_v30  ;;  %664 = vmatprep.subr.bf16.mxu1 %v663_v52  ;;  %v691_v30 = vpack.c.bf16 %v398_v28, %v397_v27 }
  0x67   :  { %676 = vmatprep.subr.bf16.mxu0 %v675_v7 }
  0x69   :  { %200 = vmatmul.mubr.f32.vlgmr.msra.gmra.mrb[0].mxu0 %v55_v37  ;;  %666 = vmatpush1.bf16.msra.mxu1 %v665_v57  ;;  %v383_v37 = vld [vmem:[%s1015_s5 + $0x50] sm:$0xff] }
  0x6a   :  { %205 = vmatprep.mubr.f32.mxu0 %v58_v41  ;;  %668 = vmatprep.subr.bf16.mxu1 %v667_v58  ;;  %v697_v41 = vpack.c.bf16 %v384_v38, %v383_v37 }
  0x6b   :  { %678 = vmatpush3.bf16.msra.mxu0 %v903_v11 }
  0x6c   :  { %680 = vmatprep.subr.bf16.mxu0 %v905_v12 }
  0x6d   :  { %206 = vmatmul.mubr.f32.gmra.mrb[2].mxu0 %v57_v45  ;;  %670 = vmatpush1.bf16.msra.mxu1 %v669_v61  ;;  %v127_v45 = vsub.s32 0, %v126_v44 }
  0x6e   :  { %672 = vmatprep.subr.bf16.mxu1 %v671_v0  ;;  %v701_v0 = vpack.c.bf16 %v386_v63, %v385_v62 }
  0x6f   :  { %682 = vmatpush3.bf16.msra.mxu0 %v681_v17  ;;  %v128_v48 = vrot.slane %v123_v46, %v127_v45 }
  0x70   :  { %684 = vmatprep.subr.bf16.mxu0 %v683_v18 }
  0x71   :  { %674 = vmatpush1.bf16.msra.mxu1 %v673_v3  ;;  %v703_v3 = vpack.c.bf16 %v404_v2, %v403_v1 }
  0x72   :  { %707 = vmatprep.subr.bf16.mxu1 %v675_v7  ;;  %v280_v7 = vld [vmem:[%s1014_s4] sm:$0x3] }
  0x73   :  { %686 = vmatpush3.bf16.msra.mxu0 %v685_v23  ;;  %v285_v8 = vrot.slane %v280_v7, %v127_v45  ;;  %v289_v9 = vrot.slane %v280_v7, %v131_v47 }
  0x74   :  { %688 = vmatprep.subr.bf16.mxu0 %v687_v24 }
  0x77   :  { %690 = vmatpush3.bf16.msra.mxu0 %v689_v29 }
  0x78   :  { %692 = vmatprep.subr.bf16.mxu0 %v691_v30 }
  0x7b   :  { %694 = vmatpush3.bf16.msra.mxu0 %v693_v35 }
  0x7c   :  { %696 = vmatprep.subr.bf16.mxu0 %v695_v36 }
  0x7f   :  { %698 = vmatpush3.bf16.msra.mxu0 %v697_v41 }
  0x80   :  { %700 = vmatprep.subr.bf16.mxu0 %v699_v42 }
  0x83   :  { %702 = vmatpush3.bf16.msra.mxu0 %v701_v0 }
  0x84   :  { %704 = vmatprep.subr.bf16.mxu0 %v703_v3 }
  0x87   :  { %706 = vmatpush3.bf16.msra.mxu0 %v705_v6 }
 0x13c   :  { %v201_v50 = vpop.f32.mrb[0].mxu0 }
 0x13d   :  { %v202_v51 = vadd.f32 %v201_v50, %v128_v48  ;;  %v203_v52 = vpop.f32.mrb[1].mxu0 }
 0x13e   :  { %v204_v53 = vadd.f32 %v203_v52, %v132_v49 }
 0x13f   :  { %v212_v56 = vmax.f32 %v202_v51, 0.0 }
 0x140   :  { %v207_v54 = vpop.f32.mrb[2].mxu0  ;;  %v213_v55 = vmax.f32 %v204_v53, 0.0 }
 0x141   :  { %v208_v57 = vadd.f32 %v207_v54, %v128_v48  ;;  %v209_v58 = vpop.f32.mrb[3].mxu0 }
 0x142   :  { %v210_v59 = vadd.f32 %v209_v58, %v132_v49  ;;  %356 = vmatprep.mubr.f32.mxu1 %v213_v55 }
 0x143   :  { %357 = vmatmul.mubr.f32.vlgmr.msra.gmra.mrb[0].mxu1 %v212_v56  ;;  %v214_v61 = vmax.f32 %v208_v57, 0.0 }
 0x144   :  { %v215_v60 = vmax.f32 %v210_v59, 0.0  ;;  %715 = vmatpush3.bf16.msra.mxu1 %v903_v11 }
 0x145   :  { %708 = vmatprep.subr.bf16.mxu1 %v905_v12 }
 0x146   :  { %362 = vmatprep.mubr.f32.mxu1 %v215_v60 }
 0x147   :  { %363 = vmatmul.mubr.f32.gmra.mrb[2].mxu1 %v214_v61 }
 0x148   :  { %716 = vmatpush3.bf16.msra.mxu1 %v681_v17 }
 0x149   :  { %709 = vmatprep.subr.bf16.mxu1 %v683_v18 }
 0x14c   :  { %717 = vmatpush3.bf16.msra.mxu1 %v685_v23  ;;  %v508_v23 = vld [vmem:[%s1016_s6] ss:$0 sm:$0xff] }
 0x14d   :  { %710 = vmatprep.subr.bf16.mxu1 %v687_v24 }
 0x150   :  { %718 = vmatpush3.bf16.msra.mxu1 %v689_v29 }
 0x151   :  { %711 = vmatprep.subr.bf16.mxu1 %v691_v30 }
 0x154   :  { %719 = vmatpush3.bf16.msra.mxu1 %v693_v35 }
 0x155   :  { %712 = vmatprep.subr.bf16.mxu1 %v695_v36 }
 0x158   :  { %720 = vmatpush3.bf16.msra.mxu1 %v697_v41 }
 0x159   :  { %713 = vmatprep.subr.bf16.mxu1 %v699_v42 }
 0x15c   :  { %721 = vmatpush3.bf16.msra.mxu1 %v701_v0 }
 0x15d   :  { %714 = vmatprep.subr.bf16.mxu1 %v703_v3 }
 0x160   :  { %722 = vmatpush3.bf16.msra.mxu1 %v705_v6 }
 0x216   :  { %v358_v10 = vpop.f32.mrb[0].mxu1 }
 0x217   :  { %v359_v11 = vadd.f32 %v358_v10, %v285_v8  ;;  %v360_v12 = vpop.f32.mrb[1].mxu1 }
 0x218   :  { %v361_v13 = vadd.f32 %v360_v12, %v289_v9 }
 0x219   :  { %v369_v16 = vmax.f32 %v359_v11, 0.0 }
 0x21a   :  { %v370_v14 = vmax.f32 %v361_v13, 0.0  ;;  %v364_v15 = vpop.f32.mrb[2].mxu1 }
 0x21b   :  { %v365_v17 = vadd.f32 %v364_v15, %v285_v8  ;;  %v366_v18 = vpop.f32.mrb[3].mxu1 }
 0x21c   :  { %v367_v19 = vadd.f32 %v366_v18, %v289_v9  ;;  %476 = vmatprep.mubr.f32.mxu0 %v370_v14 }
 0x21d   :  { %477 = vmatmul.mubr.f32.vlgmr.msra.gmra.mrb[4].mxu0 %v369_v16  ;;  %v371_v21 = vmax.f32 %v365_v17, 0.0 }
 0x21e   :  { %v372_v20 = vmax.f32 %v367_v19, 0.0 }
 0x220   :  { %481 = vmatprep.mubr.f32.mxu1 %v372_v20 }
 0x221   :  { %482 = vmatmul.mubr.f32.vlgmr.msra.gmra.mrb[4].mxu1 %v371_v21 }
 0x2f0   :  { %v541_v22 = vpop.f32.mrb[4].mxu0 }
 0x2f1   :  { %v542_v24 = vpop.f32.mrb[5].mxu0 }
 0x2f2   :  { %v543_v25 = vadd.f32 %v542_v24, %v541_v22 }
 0x2f4   :  { %v479_v26 = vadd.f32 %v543_v25, %v508_v23  ;;  %v544_v27 = vpop.f32.mrb[4].mxu1 }
 0x2f5   :  { %v545_v28 = vpop.f32.mrb[5].mxu1 }
 0x2f6   :  { %488 = vst.msk [vmem:[#allocation7] sm:$0xff] %vm487_vm0, %v479_v26  ;;  %v546_v29 = vadd.f32 %v545_v28, %v544_v27 }
 0x2f8   :  { %v484_v30 = vadd.f32 %v546_v29, %v508_v23 }
 0x2fa   :  { %489 = vst.msk [vmem:[#allocation7 + $0x8] sm:$0xff] %vm487_vm0, %v484_v30 }
 0x2fb   :  { %785 = shalt.err (!%p782_p6)
}
 0x2fc   :  { %s786_s26 = scalar_lea.hbm %s1017_s7, 256 }
 0x2fd   :  { %p787_p7 = scmp.ne.s32.totalorder %s1017_s7, %s786_s26  ;;  %p790_p8 = scmp.lt.u32.totalorder %s786_s26, %s1017_s7 }
 0x2ff   :  { %p792_p9 = pnand %p790_p8, %p787_p7 }
 0x301   :  { %795 = shalt.err (!%p792_p9)
}
 0x302   :  { %s807_s8 = smov 128   ;;  %s808_s9 = smov 8  }
 0x303   :  { %501 = dma.vmem_to_hbm [thread:$0]  %s496_s1, 256, %s1017_s7, [#allocation4], %s807_s8, %s807_s8, %s808_s9  }
 0x304   :  { %800 = dma.done.wait [#allocation4], 256  }
 0x305   :  { %801 = vsyncadd [#allocation4], 4294967040 }
 0x306   :  { %505 = vsyncpa [#allocation3], 1 }
 0x307   :  { %506 = vsyncpa [#allocation6], 1 }
 0x308   :  { %507 = vsyncpa [#allocation4], 1 }

</bundles_post_ra>
